<compile_context>
chip_gen: v6e
topology: v6e:2x2x1
jax: 0.10.0
libtpu: 0.0.40
codegen_flags: <defaults>
</compile_context>

<pallas_src>
import functools
import numpy as np
import jax
import jax.numpy as jnp
from jax.experimental import pallas as pl
from jax.experimental.pallas import tpu as pltpu

_LANE = 128
_SUBLANE = 8


def _round_up(v: int, m: int) -> int:
    return -(-v // m) * m


def _cdiv(a: int, b: int) -> int:
    return -(-a // b)


def _frequencies(n_harmonic_functions: int, omega_0: float, logspace: bool) -> np.ndarray:
    if logspace:
        f = 2.0 ** np.arange(n_harmonic_functions, dtype=np.float32)
    else:
        f = np.linspace(1.0, 2.0 ** (n_harmonic_functions - 1),
                        n_harmonic_functions, dtype=np.float32)
    return (f * omega_0).astype(np.float32)


def harmonic_kernel(f_ref, x_ref, o_ref, *, n: int, dim: int,
                    append_input: bool, out_dim: int):
    """One tile: x^T block (dim, tm) -> row-major output block (tm, out_dim).

    All sin/cos math runs lane-dense (tm rows on the 128-wide lane axis); the single
    transpose at the end fuses the layout change that previously cost an extra HBM
    round trip in the wrapper.
    """
    x = x_ref[...]                       # (dim, tm) f32  — features on sublanes
    f = f_ref[...]                       # (n, 1)   f32  — omega_0 already folded in
    tm = x.shape[1]
    pi = jnp.float32(np.pi)

    sins, coss = [], []
    for d in range(dim):                                 # static, tiny loop (dim ~ 3)
        # (1, tm) x (n, 1) broadcast multiply: per-feature frequency expansion with no
        # explicit replication.  Order (x * f) * pi matches the reference's rounding.
        sd = (x[d:d + 1, :] * f) * pi                    # (n, tm), lane-dense
        sins.append(jnp.sin(sd))
        coss.append(jnp.cos(sd))

    pieces = sins + coss                                 # d-major, k-minor (ref. order)
    if append_input:
        pieces.append(x)                                 # rows 2*dim*n .. 2*dim*n+dim-1
    pad_rows = (-out_dim) % _SUBLANE                     # sublane-align transpose source
    if pad_rows:
        pieces.append(jnp.zeros((pad_rows, tm), jnp.float32))

    big = jnp.concatenate(pieces, axis=0)                # (out_dim(+pad), tm)
    bt = big.T                                           # fused relayout (XLU), (tm, out_dim(+pad))
    o_ref[...] = bt[:, :out_dim] if pad_rows else bt


def _pick_tile_m(m: int, dim: int, out_dim: int, vmem_budget_bytes: int) -> int:
    """Row-tile (lane count) from a VMEM budget; >= 2 grid steps when M allows it."""
    out_lanes = _round_up(out_dim, _LANE)        # output block rows are lane-padded in VMEM
    big_rows = _round_up(out_dim, _SUBLANE)      # assembled pre-transpose block
    in_rows = _round_up(max(dim, 1), _SUBLANE)   # x^T block sublanes
    bytes_per_row = 4 * (2 * out_lanes           # double-buffered output block
                         + out_lanes             # transposed intermediate
                         + big_rows              # assembled lane-dense block
                         + 2 * in_rows)          # double-buffered input block
    tm = (vmem_budget_bytes // bytes_per_row) // _LANE * _LANE
    tm = max(_LANE, min(int(tm), 16384))
    tm = min(tm, _round_up(m, _LANE))
    # Ensure at least 2 grid steps when possible so ("parallel",) shards across
    # v7x's two TensorCores instead of leaving one idle.
    if _round_up(m, _LANE) >= 2 * _LANE and _cdiv(m, tm) < 2:
        tm = _round_up(_cdiv(m, 2), _LANE)
    return int(tm)


def harmonic_embedding(x,
                       n_harmonic_functions: int = 6,
                       omega_0: float = 1.0,
                       logspace: bool = True,
                       append_input: bool = True,
                       vmem_budget_bytes: int = 28 * 1024 * 1024):
    orig_shape = x.shape
    D = int(orig_shape[-1])
    M = int(np.prod(orig_shape[:-1])) if len(orig_shape) > 1 else 1
    N = int(n_harmonic_functions)
    dn = D * N
    out_dim = 2 * dn + (D if append_input else 0)

    # Frequencies passed as a real kernel input (fixes the captured-constant error).
    freqs = jnp.asarray(_frequencies(N, omega_0, logspace)).reshape(N, 1)

    # Lane-dense input layout: x^T is 13x smaller than the output, so this wrapper
    # transpose is cheap; the expensive output relayout happens inside the kernel.
    xt = x.reshape(M, D).astype(jnp.float32).T            # (D, M)

    tm = _pick_tile_m(M, D, out_dim, vmem_budget_bytes)
    grid_m = _cdiv(M, tm)

    kernel = functools.partial(harmonic_kernel, n=N, dim=D,
                               append_input=append_input, out_dim=out_dim)

    out2d = pl.pallas_call(
        kernel,
        out_shape=jax.ShapeDtypeStruct((M, out_dim), jnp.float32),
        grid_spec=pl.GridSpec(
            grid=(grid_m,),
            in_specs=[
                pl.BlockSpec((N, 1), lambda i: (0, 0)),      # frequencies (whole array)
                pl.BlockSpec((D, tm), lambda i: (0, i)),     # x^T lane-dense row tile
            ],
            out_specs=pl.BlockSpec((tm, out_dim), lambda i: (i, 0)),  # row-major tile
        ),
        compiler_params=pltpu.CompilerParams(
            dimension_semantics=("parallel",),
            vmem_limit_bytes=48 * 1024 * 1024,
        ),
    )(freqs, xt)

    return out2d.reshape(*orig_shape[:-1], out_dim)


def _reference(x, n_harmonic_functions=6, omega_0=1.0, logspace=True, append_input=True):
    freqs = jnp.asarray(_frequencies(n_harmonic_functions, omega_0, logspace))
    embed = (x[..., None] * freqs * np.pi).reshape(*x.shape[:-1], -1)
    parts = (jnp.sin(embed), jnp.cos(embed), x) if append_input else (jnp.sin(embed), jnp.cos(embed))
    return jnp.concatenate(parts, axis=-1)


if __name__ == "__main__":
    key = jax.random.PRNGKey(0)
    # Small shape consistent with [..., dim] (xyz positional encoding): (2, 8, 16, 3)
    x = jax.random.normal(key, (2, 8, 16, 3), dtype=jnp.float32)

    out = harmonic_embedding(x, n_harmonic_functions=6, omega_0=1.0,
                             logspace=True, append_input=True)
    out = jax.block_until_ready(out)

    ref = _reference(x)
    assert out.shape == ref.shape == (2, 8, 16, 3 * (2 * 6 + 1))
    np.testing.assert_allclose(np.asarray(out), np.asarray(ref), rtol=1e-5, atol=1e-5)

    # Also exercise the no-append path and a row count not divisible by the tile
    # (ragged last block, handled by Pallas edge-block semantics — no wrapper pad).
    x2 = jax.random.normal(jax.random.PRNGKey(1), (5, 7, 3), dtype=jnp.float32)
    out2 = jax.block_until_ready(
        harmonic_embedding(x2, n_harmonic_functions=4, append_input=False))
    ref2 = _reference(x2, n_harmonic_functions=4, append_input=False)
    np.testing.assert_allclose(np.asarray(out2), np.asarray(ref2), rtol=1e-5, atol=1e-5)

    print("KERNEL_OK")
</pallas_src>

<mosaic_0001>
module attributes {stable_mosaic.version = 11 : i64} {
  func.func @harmonic_kernel(%arg0: i32, %arg1: memref<6x1xf32, #tpu.memory_space<vmem>>, %arg2: memref<3x128xf32, #tpu.memory_space<vmem>>, %arg3: memref<128x39xf32, #tpu.memory_space<vmem>>) attributes {dimension_semantics = [#tpu.dimension_semantics<parallel>], iteration_bounds = array<i64: 2>, scalar_prefetch = 0 : i64, scratch_operands = 0 : i64, tpu.core_type = #tpu.core_type<tc>, window_params = [{pipeline_mode = #tpu.pipeline_mode<synchronous>, transform_indices = @transform_0, window_bounds = array<i64: 6, 1>}, {transform_indices = @transform_1, window_bounds = array<i64: 3, 128>}, {transform_indices = @transform_2, window_bounds = array<i64: 128, 39>}]} {
    %c0 = arith.constant 0 : index
    %c0_0 = arith.constant 0 : index
    %0 = vector.load %arg2[%c0, %c0_0] : memref<3x128xf32, #tpu.memory_space<vmem>>, vector<3x128xf32>
    %c0_1 = arith.constant 0 : index
    %c0_2 = arith.constant 0 : index
    %1 = vector.load %arg1[%c0_1, %c0_2] : memref<6x1xf32, #tpu.memory_space<vmem>>, vector<6x1xf32>
    %2 = vector.extract_strided_slice %0 {offsets = [0, 0], sizes = [1, 128], strides = [1, 1]} : vector<3x128xf32> to vector<1x128xf32>
    %3 = vector.broadcast %2 : vector<1x128xf32> to vector<6x128xf32>
    %4 = vector.broadcast %1 : vector<6x1xf32> to vector<6x128xf32>
    %5 = arith.mulf %3, %4 : vector<6x128xf32>
    %cst = arith.constant 3.14159274 : f32
    %6 = vector.broadcast %cst : f32 to vector<6x128xf32>
    %7 = arith.mulf %5, %6 : vector<6x128xf32>
    %8 = math.sin %7 : vector<6x128xf32>
    %9 = math.cos %7 : vector<6x128xf32>
    %10 = vector.extract_strided_slice %0 {offsets = [1, 0], sizes = [1, 128], strides = [1, 1]} : vector<3x128xf32> to vector<1x128xf32>
    %11 = vector.broadcast %10 : vector<1x128xf32> to vector<6x128xf32>
    %12 = vector.broadcast %1 : vector<6x1xf32> to vector<6x128xf32>
    %13 = arith.mulf %11, %12 : vector<6x128xf32>
    %cst_3 = arith.constant 3.14159274 : f32
    %14 = vector.broadcast %cst_3 : f32 to vector<6x128xf32>
    %15 = arith.mulf %13, %14 : vector<6x128xf32>
    %16 = math.sin %15 : vector<6x128xf32>
    %17 = math.cos %15 : vector<6x128xf32>
    %18 = vector.extract_strided_slice %0 {offsets = [2, 0], sizes = [1, 128], strides = [1, 1]} : vector<3x128xf32> to vector<1x128xf32>
    %19 = vector.broadcast %18 : vector<1x128xf32> to vector<6x128xf32>
    %20 = vector.broadcast %1 : vector<6x1xf32> to vector<6x128xf32>
    %21 = arith.mulf %19, %20 : vector<6x128xf32>
    %cst_4 = arith.constant 3.14159274 : f32
    %22 = vector.broadcast %cst_4 : f32 to vector<6x128xf32>
    %23 = arith.mulf %21, %22 : vector<6x128xf32>
    %24 = math.sin %23 : vector<6x128xf32>
    %25 = math.cos %23 : vector<6x128xf32>
    %cst_5 = arith.constant 0.000000e+00 : f32
    %26 = vector.broadcast %cst_5 : f32 to vector<1x128xf32>
    %27 = tpu.concatenate %8, %16, %24, %9, %17, %25, %0, %26 in 0 : vector<6x128xf32>, vector<6x128xf32>, vector<6x128xf32>, vector<6x128xf32>, vector<6x128xf32>, vector<6x128xf32>, vector<3x128xf32>, vector<1x128xf32> -> vector<40x128xf32>
    %28 = tpu.transpose %27, [1, 0] : vector<40x128xf32> -> vector<128x40xf32>
    %29 = vector.extract_strided_slice %28 {offsets = [0, 0], sizes = [128, 39], strides = [1, 1]} : vector<128x40xf32> to vector<128x39xf32>
    %c0_6 = arith.constant 0 : index
    %c0_7 = arith.constant 0 : index
    %30 = vector.load %arg3[%c0_6, %c0_7] : memref<128x39xf32, #tpu.memory_space<vmem>>, vector<128x39xf32>
    tpu.vector_store %arg3[%c0_6, %c0_7], %29 {strides = array<i32>} : memref<128x39xf32, #tpu.memory_space<vmem>>, vector<128x39xf32>,
    return
  }
  func.func @transform_0(%arg0: i32) -> (i32, i32) {
    %c0_i32 = arith.constant 0 : i32
    %c0_i32_0 = arith.constant 0 : i32
    %c0_i32_1 = arith.constant 0 : i32
    return %c0_i32, %c0_i32_0 : i32, i32
  }
  func.func @transform_1(%arg0: i32) -> (i32, i32) {
    %c0_i32 = arith.constant 0 : i32
    %c0_i32_0 = arith.constant 0 : i32
    return %c0_i32, %arg0 : i32, i32
  }
  func.func @transform_2(%arg0: i32) -> (i32, i32) {
    %c0_i32 = arith.constant 0 : i32
    %c0_i32_0 = arith.constant 0 : i32
    return %arg0, %c0_i32 : i32, i32
  }
}

</mosaic_0001>

<bundles_post_ra>
// kernel: tpu_custom_call.1
= control target key start
LH: loop header
LB: loop body
LE: loop exit
PB: predicated region body
PF: predicated region fallthrough
CT: control target
= control target key end

     0   :  { %s1023_s9 = smov 0   ;;  %s1339_s0 = inlined_call_operand.vmem [shape: f32[6,1], index: 0, kind: input, shape index: {}]   ;;  %s1340_s1 = inlined_call_operand.vmem [shape: f32[3,256], index: 1, kind: input, shape index: {}]   ;;  %s1341_s2 = inlined_call_operand.vmem [shape: f32[256,39], index: 2, kind: output, shape index: {}]  }
   0x1 LB: > { %s1029_s10 = sadd.s32 4294967295, %s999_s9   ;;  %p922_p0 = scmp.ge.s32.totalorder %s999_s9, 1  ;;  %s999_s9 = sphi %s1023_s9, %s12_s9  }
   0x2   : > { %p111_p1 = scmp.lt.s32.totalorder %s999_s9, 3 }
   0x4   : > { %p112_p2 = pnand %p922_p0, %p111_p1 }
   0x5   : > { %p132_p3 = scmp.lt.s32.totalorder (!%p112_p2), %s1029_s10, 1  ;;  %s924_s18 = sshll.u32 (!%p112_p2), %s1029_s10, 4 }
   0x6   : > { %115 = sbr.rel (%p112_p2) target bundleno = 434 (0x1b2), region = 28  ;;  %p137_p4 = scmp.lt.s32.totalorder (!%p112_p2), %s924_s18, 31 }
   0xb   : > { %v143_v0 = vld [vmem:[%s1339_s0] sm:$0x3f]  ;;  %v1001_v1 = vmov 0   ;;  %s133_s13 = scalar_select %p132_p3, %s1029_s10, 1  ;;  %v144_v2 = vlaneseq  ;;  %v1002_v49 = vmov 2102212464  }
   0xc   : > { %980 = vset.pattern.permute.xlu0 %v1001_v1  ;;  %v1003_v51 = vmov 920167782   ;;  %v1004_v56 = vmov 683565275   ;;  %v1005_v58 = vmov 2475754826  }
   0xd   : > { %150 = vperm.xlu0 %980, %v143_v0   ;;  %s923_s14 = sshll.u32 %s133_s13, 2  ;;  %v145_v3 = vshrl.u32 %v144_v2, 7  ;;  %v1006_v60 = vmov 2131351028   ;;  %v1007_v62 = vmov 1326507024  }
   0xe   : > { %s135_s17 = scalar_lea.vmem %s1340_s1, %s923_s14  ;;  %s1347_s18 = smov (!%p137_p4, %s924_s18), 31 }
   0xf   : > { %v146_v4 = vsub.s32 0, %v145_v3  ;;  %v364_v5 = vsub.s32 1, %v145_v3  ;;  %v577_v6 = vsub.s32 2, %v145_v3  ;;  %v1041_v7 = vld [vmem:[%s135_s17] sm:$0x7]  ;;  %s925_s19 = sshll.u32 %s1347_s18, 3 }
  0x10   : > { %s1302_s22 = scalar_lea.vmem %s1341_s2, %s925_s19 }
  0x11   : > { %v147_v8 = vrot.slane %v1041_v7, %v146_v4  ;;  %v365_v9 = vrot.slane %v1041_v7, %v364_v5  ;;  %v578_v10 = vrot.slane %v1041_v7, %v577_v6 }
  0x88   : > { %v151_v11 = vpop.permute.xlu0 %150 }
  0x89   : > { %v153_v12 = vmul.f32 %v151_v11, %v147_v8  ;;  %v366_v13 = vmul.f32 %v365_v9, %v151_v11  ;;  %v579_v14 = vmul.f32 %v578_v10, %v151_v11 }
  0x8b   : > { %v1046_v15 = vmul.f32 3.1415927, %v153_v12  ;;  %v1048_v16 = vmul.f32 3.1415927, %v366_v13  ;;  %v1050_v17 = vmul.f32 3.1415927, %v579_v14 }
  0x8d   : > { %v158_v18 = vand.u32 2139095040, %v1046_v15  ;;  %v368_v19 = vand.u32 2147483647, %v1048_v16  ;;  %v371_v20 = vand.u32 2139095040, %v1048_v16  ;;  %v581_v21 = vand.u32 2147483647, %v1050_v17 }
  0x8e   : > { %v584_v22 = vand.u32 2139095040, %v1050_v17  ;;  %v155_v23 = vand.u32 2147483647, %v1046_v15 }
  0x8f   : > { %v159_v24 = vshrl.u32 %v158_v18, 23  ;;  %v372_v25 = vshrl.u32 %v371_v20, 23  ;;  %v375_v26 = vand.u32 8388607, %v368_v19  ;;  %v588_v28 = vand.u32 8388607, %v581_v21 }
  0x90   : > { %v585_v27 = vshrl.u32 %v584_v22, 23  ;;  %v162_v32 = vand.u32 8388607, %v155_v23 }
  0x91   : > { %v926_v29 = vadd.s32 4294967169, %v159_v24  ;;  %v934_v30 = vadd.s32 4294967169, %v372_v25  ;;  %v376_v35 = vor.u32 8388608, %v375_v26  ;;  %v589_v36 = vor.u32 8388608, %v588_v28 }
  0x92   : > { %v942_v31 = vadd.s32 4294967169, %v585_v27  ;;  %v163_v38 = vor.u32 8388608, %v162_v32 }
  0x93   : > { %v165_v33 = vadd.s32 1, %v926_v29  ;;  %v378_v34 = vadd.s32 1, %v934_v30  ;;  %v1066_v43 = vshll.u32 %v376_v35, 8  ;;  %v1068_v44 = vshll.u32 %v589_v36, 8 }
  0x94   : > { %v591_v37 = vadd.s32 1, %v942_v31  ;;  %v1075_v48 = vshll.u32 %v163_v38, 8 }
  0x95   : > { %vm166_vm0 = vcmp.gt.s32.totalorder %v165_v33, 0  ;;  %vm379_vm1 = vcmp.gt.s32.totalorder %v378_v34, 0 }
  0x96   : > { %v167_v39 = vsel %vm166_vm0, %v165_v33, 0  ;;  %v380_v40 = vsel %vm379_vm1, %v378_v34, 0  ;;  %vm592_vm2 = vcmp.gt.s32.totalorder %v591_v37, 0 }
  0x97   : > { %v1064_v41 = vand.u32 31, %v167_v39  ;;  %v382_v42 = vand.u32 31, %v380_v40  ;;  %v1070_v45 = vshrl.u32 %v167_v39, 5  ;;  %v381_v47 = vshrl.u32 %v380_v40, 5 }
  0x98   : > { %v593_v54 = vsel %vm592_vm2, %v591_v37, 0 }
  0x99   : > { %v1073_v46 = vsub.s32 32, %v1064_v41  ;;  %v181_v50 = vshll.u32 %v1002_v49, %v1064_v41  ;;  %v1081_v52 = vshll.u32 %v1003_v51, %v1064_v41  ;;  %v383_v53 = vsub.s32 32, %v382_v42 }
  0x9a   : > { %v385_v57 = vshll.u32 %v1004_v56, %v382_v42  ;;  %v388_v59 = vshll.u32 %v1005_v58, %v382_v42  ;;  %v391_v61 = vshll.u32 %v1006_v60, %v382_v42  ;;  %v394_v3 = vshll.u32 %v1002_v49, %v382_v42 }
  0x9b   : > { %v182_v55 = vshrl.u32 %v1003_v51, %v1073_v46  ;;  %v1089_v63 = vshrl.u32 %v1007_v62, %v1073_v46  ;;  %v386_v0 = vshrl.u32 %v1005_v58, %v383_v53  ;;  %v389_v1 = vshrl.u32 %v1006_v60, %v383_v53 }
  0x9c   : > { %v392_v2 = vshrl.u32 %v1002_v49, %v383_v53  ;;  %v395_v4 = vshrl.u32 %v1003_v51, %v383_v53  ;;  %v397_v5 = vshll.u32 %v1003_v51, %v382_v42  ;;  %v398_v6 = vshrl.u32 %v1007_v62, %v383_v53 }
  0x9d   : > { %v384_v8 = vshrl.u32 %v1004_v56, %v383_v53  ;;  %v387_v9 = vor.u32 %v386_v0, %v385_v57  ;;  %v390_v10 = vor.u32 %v389_v1, %v388_v59  ;;  %v1098_v12 = vor.u32 %v182_v55, %v181_v50 }
  0x9e   : > { %v393_v11 = vor.u32 %v392_v2, %v391_v61  ;;  %v396_v13 = vor.u32 %v395_v4, %v394_v3  ;;  %v399_v14 = vor.u32 %v398_v6, %v397_v5  ;;  %vm400_vm3 = vcmp.lt.s32.totalorder %v381_v47, 1 }
  0x9f   : > { %v186_v18 = vor.u32 %v1089_v63, %v1081_v52  ;;  %vm402_vm4 = vcmp.lt.s32.totalorder %v381_v47, 3  ;;  %vm403_vm5 = vcmp.lt.s32.totalorder %v381_v47, 4  ;;  %v404_v20 = vsel %vm400_vm3, %v384_v8, %v387_v9 }
  0xa0   : > { %v405_v22 = vsel %vm403_vm5, %v393_v11, 2102212464  ;;  %v408_v24 = vsel %vm400_vm3, %v387_v9, %v390_v10  ;;  %v409_v25 = vsel %vm403_vm5, %v396_v13, 920167782  ;;  %v412_v26 = vsel %vm400_vm3, %v390_v10, %v393_v11 }
  0xa1   : > { %vm401_vm6 = vcmp.lt.s32.totalorder %v381_v47, 2  ;;  %v406_v27 = vsel %vm402_vm4, %v390_v10, %v405_v22  ;;  %v410_v28 = vsel %vm402_vm4, %v393_v11, %v409_v25  ;;  %v413_v29 = vsel %vm403_vm5, %v399_v14, 1326507024 }
  0xa2   : > { %v407_v30 = vsel %vm401_vm6, %v404_v20, %v406_v27  ;;  %v411_v31 = vsel %vm401_vm6, %v408_v24, %v410_v28  ;;  %v414_v32 = vsel %vm402_vm4, %v396_v13, %v413_v29  ;;  %v595_v33 = vand.u32 31, %v593_v54 }
  0xa3   : > { %v415_v34 = vsel %vm401_vm6, %v412_v26, %v414_v32  ;;  %v1103_v35 = vmul.u32.u64.low %v1066_v43, %v411_v31  ;;  %v1104_v36 = vmul.u32.u64.high %v1066_v43, %v411_v31, %v1103_v35  ;;  %v594_v37 = vshrl.u32 %v593_v54, 5 }
  0xa4   : > { %vm190_vm7 = vcmp.lt.s32.totalorder %v1070_v45, 4  ;;  %v1109_v38 = vmul.u32.u64.low %v1066_v43, %v415_v34  ;;  %v1110_v39 = vmul.u32.u64.high %v1066_v43, %v415_v34, %v1109_v38  ;;  %v423_v40 = vmul.u32 %v1066_v43, %v407_v30 }
  0xa5   : > { %v596_v42 = vsub.s32 32, %v595_v33  ;;  %v598_v47 = vshll.u32 %v1004_v56, %v595_v33  ;;  %v601_v50 = vshll.u32 %v1005_v58, %v595_v33  ;;  %v604_v52 = vshll.u32 %v1006_v60, %v595_v33 }
  0xa6   : > { %v607_v53 = vshll.u32 %v1002_v49, %v595_v33  ;;  %v610_v59 = vshll.u32 %v1003_v51, %v595_v33  ;;  %v426_v61 = vadd.s32 1, %v1104_v36  ;;  %vm425_vm8 = vc.u32 %v1110_v39, %v1103_v35 }
  0xa7   : > { %v599_v55 = vshrl.u32 %v1005_v58, %v596_v42  ;;  %v602_v54 = vshrl.u32 %v1006_v60, %v596_v42  ;;  %v605_v57 = vshrl.u32 %v1002_v49, %v596_v42  ;;  %v597_v43 = vshrl.u32 %v1004_v56, %v596_v42 }
  0xa8   : > { %v608_v63 = vshrl.u32 %v1003_v51, %v596_v42  ;;  %v611_v0 = vshrl.u32 %v1007_v62, %v596_v42  ;;  %vm613_vm9 = vcmp.lt.s32.totalorder %v594_v37, 1  ;;  %v427_v3 = vsel %vm425_vm8, %v426_v61, %v1104_v36 }
  0xa9   : > { %v600_v1 = vor.u32 %v599_v55, %v598_v47  ;;  %v603_v2 = vor.u32 %v602_v54, %v601_v50  ;;  %v606_v4 = vor.u32 %v605_v57, %v604_v52  ;;  %v428_v8 = vadd.s32 %v427_v3, %v423_v40 }
  0xaa   : > { %v609_v5 = vor.u32 %v608_v63, %v607_v53  ;;  %v612_v6 = vor.u32 %v611_v0, %v610_v59  ;;  %vm614_vm10 = vcmp.lt.s32.totalorder %v594_v37, 2  ;;  %vm615_vm11 = vcmp.lt.s32.totalorder %v594_v37, 3 }
  0xab   : > { %vm616_vm12 = vcmp.lt.s32.totalorder %v594_v37, 4  ;;  %v617_v9 = vsel %vm613_vm9, %v597_v43, %v600_v1  ;;  %v621_v51 = vsel %vm613_vm9, %v600_v1, %v603_v2  ;;  %v429_v11 = vadd.s32 536870912, %v428_v8 }
  0xac   : > { %v618_v10 = vsel %vm616_vm12, %v606_v4, 2102212464  ;;  %v622_v62 = vsel %vm616_vm12, %v609_v5, 920167782  ;;  %v625_v20 = vsel %vm613_vm9, %v603_v2, %v606_v4  ;;  %v196_v22 = vsel %vm190_vm7, %v1098_v12, 920167782 }
  0xad   : > { %v619_v13 = vsel %vm615_vm11, %v603_v2, %v618_v10  ;;  %v623_v14 = vsel %vm615_vm11, %v606_v4, %v622_v62  ;;  %v200_v24 = vsel %vm190_vm7, %v186_v18, 1326507024  ;;  %v626_v26 = vsel %vm616_vm12, %v612_v6, 1326507024 }
  0xae   : > { %v624_v25 = vsel %vm614_vm10, %v621_v51, %v623_v14  ;;  %v1136_v27 = vshrl.u32 %v429_v11, 30  ;;  %v627_v28 = vsel %vm615_vm11, %v609_v5, %v626_v26  ;;  %v620_v31 = vsel %vm614_vm10, %v617_v9, %v619_v13 }
  0xaf   : > { %v1139_v29 = vmul.u32.u64.low %v1068_v44, %v624_v25  ;;  %v1140_v30 = vmul.u32.u64.high %v1068_v44, %v624_v25, %v1139_v29  ;;  %v628_v32 = vsel %vm614_vm10, %v625_v20, %v627_v28  ;;  %v172_v33 = vshll.u32 %v1004_v56, %v1064_v41 }
  0xb0   : > { %v173_v18 = vshrl.u32 %v1005_v58, %v1073_v46  ;;  %v431_v34 = vshll.u32 %v1136_v27, 30  ;;  %v1151_v36 = vmul.u32.u64.low %v1068_v44, %v628_v32  ;;  %v1152_v38 = vmul.u32.u64.high %v1068_v44, %v628_v32, %v1151_v36 }
  0xb1   : > { %v175_v40 = vshll.u32 %v1005_v58, %v1064_v41  ;;  %v176_v37 = vshrl.u32 %v1006_v60, %v1073_v46  ;;  %v178_v47 = vshll.u32 %v1006_v60, %v1064_v41  ;;  %v179_v50 = vshrl.u32 %v1002_v49, %v1073_v46 }
  0xb2   : > { %v174_v42 = vor.u32 %v173_v18, %v172_v33  ;;  %v432_v52 = vsub.s32 %v428_v8, %v431_v34  ;;  %v636_v53 = vmul.u32 %v1068_v44, %v620_v31  ;;  %v639_v55 = vadd.s32 1, %v1140_v30 }
  0xb3   : > { %v171_v54 = vshrl.u32 %v1004_v56, %v1073_v46  ;;  %v177_v57 = vor.u32 %v176_v37, %v175_v40  ;;  %v180_v58 = vor.u32 %v179_v50, %v178_v47  ;;  %vm187_vm13 = vcmp.lt.s32.totalorder %v1070_v45, 1 }
  0xb4   : > { %vm189_vm14 = vcmp.lt.s32.totalorder %v1070_v45, 3  ;;  %v434_v59 = vsub.s32 0, %v432_v52  ;;  %vm638_vm15 = vc.u32 %v1152_v38, %v1139_v29  ;;  %vm188_vm0 = vcmp.lt.s32.totalorder %v1070_v45, 2 }
  0xb5   : > { %v201_v41 = vsel %vm189_vm14, %v1098_v12, %v200_v24  ;;  %v640_v44 = vsel %vm638_vm15, %v639_v55, %v1140_v30  ;;  %v192_v46 = vsel %vm190_vm7, %v180_v58, 2102212464  ;;  %v195_v49 = vsel %vm187_vm13, %v174_v42, %v177_v57 }
  0xb6   : > { %v197_v56 = vsel %vm189_vm14, %v180_v58, %v196_v22  ;;  %v935_v60 = vmin.u32 %v434_v59, %v432_v52  ;;  %v641_v61 = vadd.s32 %v640_v44, %v636_v53  ;;  %v191_v63 = vsel %vm187_vm13, %v171_v54, %v174_v42 }
  0xb7   : > { %v198_v43 = vsel %vm188_vm0, %v195_v49, %v197_v56  ;;  %v199_v0 = vsel %vm187_vm13, %v177_v57, %v180_v58  ;;  %v193_v4 = vsel %vm189_vm14, %v177_v57, %v192_v46  ;;  %v424_v13 = vadd.s32 %v1103_v35, %v1110_v39 }
  0xb8   : > { %v1182_v1 = vmul.u32.u64.low %v1075_v48, %v198_v43  ;;  %v1183_v2 = vmul.u32.u64.high %v1075_v48, %v198_v43, %v1182_v1  ;;  %v436_v12 = vclz %v935_v60  ;;  %v642_v3 = vadd.s32 536870912, %v641_v61 }
  0xb9   : > { %v202_v5 = vsel %vm188_vm0, %v199_v0, %v201_v41  ;;  %v194_v51 = vsel %vm188_vm0, %v191_v63, %v193_v4  ;;  %vm370_vm4 = vcmp.lt.s32.totalorder %v1048_v16, 0  ;;  %vm1216_vm5 = vcmp.le.f32.partialorder %v368_v19, 0.7853982 }
  0xba   : > { %v1191_v6 = vmul.u32.u64.low %v1075_v48, %v202_v5  ;;  %v1192_v8 = vmul.u32.u64.high %v1075_v48, %v202_v5, %v1191_v6  ;;  %v936_v9 = vadd.s32 4294967294, %v436_v12  ;;  %v1194_v10 = vshrl.u32 %v642_v3, 30 }
  0xbb   : > { %v213_v62 = vadd.s32 1, %v1183_v2  ;;  %v210_v25 = vmul.u32 %v1075_v48, %v194_v51  ;;  %vm583_vm7 = vcmp.lt.s32.totalorder %v1050_v17, 0  ;;  %vm1228_vm8 = vcmp.le.f32.partialorder %v581_v21, 0.7853982 }
  0xbc   : > { %vm937_vm1 = vcmp.lt.s32.totalorder %v936_v9, 0  ;;  %v644_v11 = vshll.u32 %v1194_v10, 30  ;;  %vm212_vm2 = vc.u32 %v1192_v8, %v1182_v1  ;;  %v211_v5 = vadd.s32 %v1182_v1, %v1192_v8 }
  0xbd   : > { %v439_v14 = vsel %vm937_vm1, 0, %v936_v9  ;;  %v214_v45 = vsel %vm212_vm2, %v213_v62, %v1183_v2  ;;  %vm157_vm9 = vcmp.lt.s32.totalorder %v1046_v15, 0  ;;  %vm156_vm10 = vcmp.le.f32.partialorder %v155_v23, 0.7853982 }
  0xbe   : > { %v440_v20 = vsub.s32 32, %v439_v14  ;;  %v444_v22 = vsub.s32 4294967266, %v439_v14  ;;  %v645_v24 = vsub.s32 %v641_v61, %v644_v11  ;;  %v215_v31 = vadd.s32 %v214_v45, %v210_v25 }
  0xbf   : > { %v441_v32 = vshll.u32 %v432_v52, %v439_v14  ;;  %v637_v52 = vadd.s32 %v1139_v29, %v1152_v38  ;;  %vm460_vm0 = vweird.f32 %v1048_v16  ;;  %vm803_vm1 = vcmask 1045504  }
  0xc0   : > { %v442_v26 = vshrl.u32 %v424_v13, %v440_v20  ;;  %v445_v28 = vadd.s32 127, %v444_v22  ;;  %v647_v30 = vsub.s32 0, %v645_v24  ;;  %v216_v34 = vadd.s32 536870912, %v215_v31 }
  0xc1   : > { %v454_v22 = vsub.s32 4, %v1136_v27  ;;  %vm247_vm2 = vweird.f32 %v1046_v15 }
  0xc2   : > { %v446_v33 = vshll.u32 %v445_v28, 23  ;;  %v943_v18 = vmin.u32 %v647_v30, %v645_v24  ;;  %v443_v35 = vor.u32 %v442_v26, %v441_v32  ;;  %v1206_v40 = vshrl.u32 %v216_v34, 30 }
  0xc3   : > { %v455_v21 = vsel %vm370_vm4, %v454_v22, %v1136_v27  ;;  %v667_v26 = vsub.s32 4, %v1194_v10 }
  0xc4   : > { %v447_v39 = vor.u32 4788187, %v446_v33  ;;  %v649_v36 = vclz %v943_v18  ;;  %v218_v47 = vshll.u32 %v1206_v40, 30  ;;  %v450_v48 = vcvt.s32.f32 %v443_v35 }
  0xc5   : > { %v1244_v30 = vsel %vm1216_vm5, 0, %v455_v21  ;;  %v241_v32 = vsub.s32 4, %v1206_v40  ;;  %v668_v33 = vsel %vm583_vm7, %v667_v26, %v1194_v10 }
  0xc6   : > { %v448_v42 = vand.u32 2147483647, %v447_v39  ;;  %v944_v37 = vadd.s32 4294967294, %v649_v36  ;;  %v219_v50 = vsub.s32 %v215_v31, %v218_v47  ;;  %v461_v18 = vadd.s32 3, %v1244_v30 }
  0xc7   : > { %v670_v39 = vsel %vm1228_vm8, 0, %v668_v33 }
  0xc8   : > { %vm945_vm3 = vcmp.lt.s32.totalorder %v944_v37, 0  ;;  %v451_v53 = vmul.f32 %v450_v48, %v448_v42  ;;  %v221_v58 = vsub.s32 0, %v219_v50  ;;  %v242_v42 = vsel %vm157_vm9, %v241_v32, %v1206_v40 }
  0xc9   : > { %v652_v55 = vsel %vm945_vm3, 0, %v944_v37  ;;  %v462_v10 = vand.u32 3, %v461_v18  ;;  %v674_v37 = vadd.s32 3, %v670_v39  ;;  %v244_v23 = vsel %vm156_vm10, 0, %v242_v42 }
  0xca   : > { %v653_v54 = vsub.s32 32, %v652_v55  ;;  %v657_v57 = vsub.s32 4294967266, %v652_v55  ;;  %v654_v59 = vshll.u32 %v645_v24, %v652_v55  ;;  %v452_v46 = vxor.u32 2147483648, %v451_v53 }
  0xcb   : > { %v927_v49 = vmin.u32 %v221_v58, %v219_v50  ;;  %v248_v55 = vadd.s32 3, %v244_v23  ;;  %vm464_vm11 = vcmp.eq.s32.totalorder %v462_v10, 0  ;;  %vm467_vm12 = vcmp.eq.s32.totalorder %v462_v10, 2 }
  0xcc   : > { %v655_v41 = vshrl.u32 %v637_v52, %v653_v54  ;;  %v658_v44 = vadd.s32 127, %v657_v57  ;;  %v453_v63 = vsel %vm370_vm4, %v452_v46, %v451_v53  ;;  %v675_v52 = vand.u32 3, %v674_v37 }
  0xcd   : > { %v223_v61 = vclz %v927_v49  ;;  %v456_v12 = vsel %vm1216_vm5, %v1048_v16, %v453_v63  ;;  %vm463_vm13 = vcmp.lt.s32.totalorder %v462_v10, 2  ;;  %vm673_vm3 = vweird.f32 %v1050_v17 }
  0xce   : > { %v656_v56 = vor.u32 %v655_v41, %v654_v59  ;;  %v659_v60 = vshll.u32 %v658_v44, 23  ;;  %981 = vcosq.f32 %v456_v12  ;;  %v352_v59 = vand.u32 3, %v244_v23 }
  0xcf   : > { %v928_v0 = vadd.s32 4294967294, %v223_v61  ;;  %983 = vsinq.f32 %v456_v12  ;;  %vm677_vm14 = vcmp.eq.s32.totalorder %v675_v52, 0  ;;  %vm680_vm15 = vcmp.eq.s32.totalorder %v675_v52, 2 }
  0xd0   : > { %v660_v43 = vor.u32 4788187, %v659_v60  ;;  %v663_v29 = vcvt.s32.f32 %v656_v56  ;;  %v249_v44 = vand.u32 3, %v248_v55  ;;  %vm676_vm4 = vcmp.lt.s32.totalorder %v675_v52, 2 }
  0xd1   : > { %vm929_vm6 = vcmp.lt.s32.totalorder %v928_v0, 0  ;;  %vm353_vm5 = vcmp.lt.s32.totalorder %v352_v59, 2 }
  0xd2   : > { %v661_v2 = vand.u32 2147483647, %v660_v43  ;;  %v226_v4 = vsel %vm929_vm6, 0, %v928_v0  ;;  %v778_v0 = vand.u32 3, %v670_v39  ;;  %vm254_vm6 = vcmp.eq.s32.totalorder %v249_v44, 2 }
  0xd3   : > { %v227_v6 = vsub.s32 32, %v226_v4  ;;  %v231_v9 = vsub.s32 4294967266, %v226_v4  ;;  %v228_v19 = vshll.u32 %v219_v50, %v226_v4 }
  0xd4   : > { %v664_v3 = vmul.f32 %v663_v29, %v661_v2 }
  0xd5   : > { %v229_v62 = vshrl.u32 %v211_v5, %v227_v6  ;;  %v232_v11 = vadd.s32 127, %v231_v9 }
  0xd6   : > { %v665_v51 = vxor.u32 2147483648, %v664_v3 }
  0xd7   : > { %v230_v8 = vor.u32 %v229_v62, %v228_v19  ;;  %v233_v20 = vshll.u32 %v232_v11, 23 }
  0xd8   : > { %v666_v14 = vsel %vm583_vm7, %v665_v51, %v664_v3  ;;  %vm354_vm7 = vcmp.eq.s32.totalorder %v352_v59, 0 }
  0xd9   : > { %v669_v1 = vsel %vm1228_vm8, %v1050_v17, %v666_v14  ;;  %v234_v24 = vor.u32 4788187, %v233_v20  ;;  %v237_v45 = vcvt.s32.f32 %v230_v8  ;;  %vm357_vm8 = vcmp.eq.s32.totalorder %v352_v59, 2 }
  0xda   : > { %985 = vcosq.f32 %v669_v1  ;;  %v565_v14 = vand.u32 3, %v1244_v30 }
  0xdb   : > { %987 = vsinq.f32 %v669_v1  ;;  %v235_v25 = vand.u32 2147483647, %v234_v24  ;;  %v1254_v34 = vpop.eup %981 }
  0xdc   : > { %v1259_v36 = vpop.eup %983  ;;  %v468_v50 = vxor.u32 2147483648, %v1254_v34 }
  0xdd   : > { %v238_v28 = vmul.f32 %v237_v45, %v235_v25  ;;  %v465_v48 = vxor.u32 2147483648, %v1259_v36 }
  0xde   : > { %v469_v40 = vsel %vm467_vm12, %v468_v50, %v1259_v36  ;;  %vm783_vm12 = vcmp.eq.s32.totalorder %v778_v0, 2 }
  0xdf   : > { %v239_v31 = vxor.u32 2147483648, %v238_v28  ;;  %v466_v54 = vsel %vm464_vm11, %v1254_v34, %v465_v48  ;;  %vm780_vm11 = vcmp.eq.s32.totalorder %v778_v0, 0 }
  0xe0   : > { %v470_v41 = vsel %vm463_vm13, %v466_v54, %v469_v40  ;;  %vm805_vm13 = vcmask 1043456  }
  0xe1   : > { %v240_v27 = vsel %vm157_vm9, %v239_v31, %v238_v28  ;;  %v471_v60 = vsel %vm460_vm0, nan, %v470_v41  ;;  %vm251_vm9 = vcmp.eq.s32.totalorder %v249_v44, 0  ;;  %v801_v28 = vrot.slane %v1041_v7, 4 }
  0xe2   : > { %v243_v35 = vsel %vm156_vm10, %v1046_v15, %v240_v27  ;;  %v789_v12 = vrot.slane %v471_v60, 2  ;;  %vm250_vm10 = vcmp.lt.s32.totalorder %v249_v44, 2 }
  0xe3   : > { %989 = vcosq.f32 %v243_v35 }
  0xe4   : > { %991 = vsinq.f32 %v243_v35 }
  0xe7   : > { %v986_v47 = vpop.eup %985 }
  0xe8   : > { %v988_v53 = vpop.eup %987  ;;  %v681_v58 = vxor.u32 2147483648, %v986_v47 }
  0xe9   : > { %v678_v57 = vxor.u32 2147483648, %v988_v53 }
  0xea   : > { %v682_v49 = vsel %vm680_vm15, %v681_v58, %v988_v53  ;;  %v785_v62 = vsel %vm783_vm12, %v681_v58, %v988_v53  ;;  %vm567_vm15 = vcmp.eq.s32.totalorder %v565_v14, 0 }
  0xeb   : > { %v679_v46 = vsel %vm677_vm14, %v986_v47, %v678_v57  ;;  %v782_v19 = vsel %vm780_vm11, %v986_v47, %v678_v57  ;;  %vm779_vm14 = vcmp.lt.s32.totalorder %v778_v0, 2  ;;  %v569_v24 = vsel %vm567_vm15, %v1254_v34, %v465_v48 }
  0xec   : > { %v683_v63 = vsel %vm676_vm4, %v679_v46, %v682_v49  ;;  %v786_v8 = vsel %vm779_vm14, %v782_v19, %v785_v62  ;;  %vm570_vm4 = vcmp.eq.s32.totalorder %v565_v14, 2 }
  0xed   : > { %v684_v5 = vsel %vm673_vm3, nan, %v683_v63  ;;  %v572_v15 = vsel %vm570_vm4, %v468_v50, %v1259_v36  ;;  %v787_v25 = vsel %vm673_vm3, nan, %v786_v8 }
  0xee   : > { %v792_v13 = vrot.slane %v684_v5, 4  ;;  %v798_v26 = vrot.slane %v787_v25, 2 }
  0xf0   : > { %v990_v56 = vpop.eup %989  ;;  %v806_v22 = vsel %vm805_vm13, %v789_v12, %v792_v13  ;;  %v810_v32 = vsel %vm805_vm13, %v798_v26, %v801_v28 }
  0xf1   : > { %v992_v61 = vpop.eup %991  ;;  %v255_v43 = vxor.u32 2147483648, %v990_v56 }
  0xf2   : > { %v252_v2 = vxor.u32 2147483648, %v992_v61 }
  0xf3   : > { %v256_v29 = vsel %vm254_vm6, %v255_v43, %v992_v61  ;;  %v359_v38 = vsel %vm357_vm8, %v255_v43, %v992_v61  ;;  %vm811_vm6 = vcmask 1046528  }
  0xf4   : > { %v253_v3 = vsel %vm251_vm9, %v990_v56, %v252_v2  ;;  %v356_v4 = vsel %vm354_vm7, %v990_v56, %v252_v2  ;;  %v812_v33 = vsel %vm811_vm6, %v810_v32, 0.0 }
  0xf5   : > { %v257_v6 = vsel %vm250_vm10, %v253_v3, %v256_v29  ;;  %v360_v9 = vsel %vm353_vm5, %v356_v4, %v359_v38  ;;  %vm807_vm5 = vcmask 1041408  }
  0xf6   : > { %v258_v51 = vsel %vm247_vm2, nan, %v257_v6  ;;  %v361_v1 = vsel %vm247_vm2, nan, %v360_v9  ;;  %vm566_vm2 = vcmp.lt.s32.totalorder %v565_v14, 2 }
  0xf7   : > { %v804_v11 = vsel %vm803_vm1, %v258_v51, %v789_v12  ;;  %v795_v20 = vrot.slane %v361_v1, 6  ;;  %v573_v21 = vsel %vm566_vm2, %v569_v24, %v572_v15 }
  0xf8   : > { %813 = vxpose.xlu0.b32.start [1/5] (short) %v804_v11, 128  ;;  %v574_v30 = vsel %vm460_vm0, nan, %v573_v21  ;;  %vm845_vm0 = vcmask 318464  }
  0xf9   : > { %v808_v45 = vsel %vm807_vm5, %v792_v13, %v795_v20  ;;  %v809_v31 = vsel %vm803_vm1, %v574_v30, %v798_v26 }
  0xfc   : > { %814 = vxpose.xlu0.b32.cont [2/5] (short) %v806_v22, 128 }
 0x100   : > { %815 = vxpose.xlu0.b32.cont [3/5] (short) %v808_v45, 128 }
 0x104   : > { %816 = vxpose.xlu0.b32.cont [4/5] (short) %v809_v31, 128 }
 0x108   : > { %817 = vxpose.xlu0.b32.end [5/5] (short) %v812_v33, 128 }
 0x174   : > { %v829_v7 = vpop.trf.xlu0 }
 0x175   : > { %846 = vst.msk [vmem:[%s1302_s22] sm:$0xff] %vm845_vm0, %v829_v7 }
 0x178   : > { %v830_v16 = vpop.trf.xlu0 }
 0x179   : > { %847 = vst.msk [vmem:[%s1302_s22 + $0x8] sm:$0xff] %vm845_vm0, %v830_v16 }
 0x17c   : > { %v831_v17 = vpop.trf.xlu0 }
 0x17d   : > { %848 = vst.msk [vmem:[%s1302_s22 + $0x10] sm:$0xff] %vm845_vm0, %v831_v17 }
 0x180   : > { %v832_v27 = vpop.trf.xlu0 }
 0x181   : > { %849 = vst.msk [vmem:[%s1302_s22 + $0x18] sm:$0xff] %vm845_vm0, %v832_v27 }
 0x184   : > { %v833_v18 = vpop.trf.xlu0 }
 0x185   : > { %850 = vst.msk [vmem:[%s1302_s22 + $0x20] sm:$0xff] %vm845_vm0, %v833_v18 }
 0x188   : > { %v834_v34 = vpop.trf.xlu0 }
 0x189   : > { %851 = vst.msk [vmem:[%s1302_s22 + $0x28] sm:$0xff] %vm845_vm0, %v834_v34 }
 0x18c   : > { %v835_v35 = vpop.trf.xlu0 }
 0x18d   : > { %852 = vst.msk [vmem:[%s1302_s22 + $0x30] sm:$0xff] %vm845_vm0, %v835_v35 }
 0x190   : > { %v836_v39 = vpop.trf.xlu0 }
 0x191   : > { %853 = vst.msk [vmem:[%s1302_s22 + $0x38] sm:$0xff] %vm845_vm0, %v836_v39 }
 0x194   : > { %v837_v36 = vpop.trf.xlu0 }
 0x195   : > { %854 = vst.msk [vmem:[%s1302_s22 + $0x40] sm:$0xff] %vm845_vm0, %v837_v36 }
 0x198   : > { %v838_v42 = vpop.trf.xlu0 }
 0x199   : > { %855 = vst.msk [vmem:[%s1302_s22 + $0x48] sm:$0xff] %vm845_vm0, %v838_v42 }
 0x19c   : > { %v839_v10 = vpop.trf.xlu0 }
 0x19d   : > { %856 = vst.msk [vmem:[%s1302_s22 + $0x50] sm:$0xff] %vm845_vm0, %v839_v10 }
 0x1a0   : > { %v840_v37 = vpop.trf.xlu0 }
 0x1a1   : > { %857 = vst.msk [vmem:[%s1302_s22 + $0x58] sm:$0xff] %vm845_vm0, %v840_v37 }
 0x1a4   : > { %v841_v47 = vpop.trf.xlu0 }
 0x1a5   : > { %858 = vst.msk [vmem:[%s1302_s22 + $0x60] sm:$0xff] %vm845_vm0, %v841_v47 }
 0x1a8   : > { %v842_v23 = vpop.trf.xlu0 }
 0x1a9   : > { %859 = vst.msk [vmem:[%s1302_s22 + $0x68] sm:$0xff] %vm845_vm0, %v842_v23 }
 0x1ac   : > { %v843_v48 = vpop.trf.xlu0 }
 0x1ad   : > { %860 = vst.msk [vmem:[%s1302_s22 + $0x70] sm:$0xff] %vm845_vm0, %v843_v48 }
 0x1b0   : > { %v844_v50 = vpop.trf.xlu0 }
 0x1b1   : > { %861 = vst.msk [vmem:[%s1302_s22 + $0x78] sm:$0xff] %vm845_vm0, %v844_v50 }
 0x1b2 PF: > { %s12_s9 = sadd.s32 1, %s999_s9  }
 0x1b3   : > { %p9_p5 = scmp.ge.s32.totalorder %s12_s9, 4  }
 0x1b5   :  { %11 = sbr.rel (!%p9_p5) target bundleno = 1 (0x1), region = 58 }

</bundles_post_ra>
